<compile_context>
chip_gen: v7x
topology: tpu7x:2x2x1
jax: 0.10.0
libtpu: 0.0.40
codegen_flags: <defaults>
</compile_context>

<pallas_src>
import jax
import jax.numpy as jnp
from jax import lax
from jax.experimental import pallas as pl
from jax.experimental.pallas import tpu as pltpu


def _round_up(x, m):
    return ((x + m - 1) // m) * m


def _arc_head_kernel(x_ref, w_ref, b_ref, o_ref, acc_ref):
    """Grid step (row-tile i, K-tile k) of  out = L2normalize(x @ W' + b')."""
    k = pl.program_id(1)

    @pl.when(k == 0)
    def _():
        acc_ref[...] = jnp.zeros_like(acc_ref)

    # MXU matmul, f32 accumulation (x / W' may be bf16).
    acc_ref[...] += jnp.dot(x_ref[...], w_ref[...],
                            preferred_element_type=jnp.float32)

    @pl.when(k == pl.num_programs(1) - 1)
    def _():
        z = acc_ref[...] + b_ref[...]
        # F.normalize(dim=1, eps=1e-12): x / max(||x||, 1e-12) == x * rsqrt(max(||x||^2, 1e-24))
        ss = jnp.sum(z * z, axis=-1, keepdims=True)
        inv = lax.rsqrt(jnp.maximum(ss, 1e-24))          # EUP rsqrt (free slot vs VPU divide)
        o_ref[...] = (z * inv).astype(o_ref.dtype)


def prepare_arc_head_params(params, feat_shape_chw, *, eps=1e-5,
                            weight_dtype=jnp.bfloat16):
    """One-time offline fold of bn1 -> fc1 -> bn2 (all eval-mode) into W' (D, CS) and b' (CS,),
    zero-padded so the trailing dims are lane-dense (multiples of 128)."""
    C, H, W = feat_shape_chw

    # bn1 (BatchNorm2d, eval): per-channel affine, broadcast over (H, W), flattened like .view(N,-1)
    s1c = params["bn1_gamma"] / jnp.sqrt(params["bn1_var"] + eps)            # (C,)
    b1c = params["bn1_beta"] - params["bn1_mean"] * s1c                      # (C,)
    s1 = jnp.broadcast_to(s1c[:, None, None], (C, H, W)).reshape(-1)         # (D,)
    b1 = jnp.broadcast_to(b1c[:, None, None], (C, H, W)).reshape(-1)         # (D,)

    # fc1: torch Linear stores (out, in); matmul wants (in, out)
    w = params["fc1_w"].T.astype(jnp.float32)                                # (D, CS)
    fcb = params["fc1_b"].astype(jnp.float32)                                # (CS,)

    # bn2 (BatchNorm1d, eval): per-feature affine
    s2 = params["bn2_gamma"] / jnp.sqrt(params["bn2_var"] + eps)             # (CS,)
    b2 = params["bn2_beta"] - params["bn2_mean"] * s2                        # (CS,)

    # Fold:  bn2(fc1(bn1(x)))  ==  x @ W' + b'
    w_f = (s1[:, None] * w) * s2[None, :]                                    # (D, CS)
    b_f = (b1 @ w + fcb) * s2 + b2                                           # (CS,)

    D, CS = w_f.shape
    Dp, CSp = _round_up(D, 128), _round_up(CS, 128)
    w_p = jnp.zeros((Dp, CSp), jnp.float32).at[:D, :CS].set(w_f).astype(weight_dtype)
    b_p = jnp.zeros((1, CSp), jnp.float32).at[0, :CS].set(b_f)
    return {"w": w_p, "b": b_p, "D": int(D), "CS": int(CS)}


def _pick_tk(Dp, tk_max):
    """Largest multiple of 128 that divides Dp and is <= tk_max (Dp is a multiple of 128)."""
    best, t, lim = 128, 128, min(Dp, tk_max)
    while t <= lim:
        if Dp % t == 0:
            best = t
        t += 128
    return best


def arc_head_forward(feat_nchw, prepared, *, tk_max=4096, tm_max=128):
    """feat_nchw: (N, C, 5, 8) backbone feature map -> (N, channel_size) L2-normalized.

    tk_max = 4096 keeps the (tk, CS) bf16 weight tile ~4 MiB (x2 double-buffer) -> fits the
    32 MiB scoped / 64 MiB physical VMEM on v7x while staying on the HBM roofline; on v6e a
    larger tk_max (8192-16384) can be swept.
    """
    N, C, H, W = feat_nchw.shape
    w_p, b_p = prepared["w"], prepared["b"]
    D, CS = prepared["D"], prepared["CS"]
    Dp, CSp = w_p.shape

    # torch .view(N, -1); cast activations to the streamed-weight dtype (bf16) for the MXU.
    x = feat_nchw.reshape(N, C * H * W).astype(w_p.dtype)

    tm = min(_round_up(N, 8), tm_max)          # sublane-aligned row tile
    Np = _round_up(N, tm)
    if (Np, Dp) != (N, D):
        x = jnp.zeros((Np, Dp), x.dtype).at[:N, :D].set(x)

    tk = _pick_tk(Dp, tk_max)
    grid = (Np // tm, Dp // tk)

    itemsize = jnp.dtype(w_p.dtype).itemsize
    out = pl.pallas_call(
        _arc_head_kernel,
        out_shape=jax.ShapeDtypeStruct((Np, CSp), jnp.float32),
        grid_spec=pltpu.PrefetchScalarGridSpec(
            num_scalar_prefetch=0,
            grid=grid,
            in_specs=[
                pl.BlockSpec((tm, tk), lambda i, k: (i, k)),    # activations
                pl.BlockSpec((tk, CSp), lambda i, k: (k, 0)),   # folded weight, streamed over k
                pl.BlockSpec((1, CSp), lambda i, k: (0, 0)),    # folded bias
            ],
            out_specs=pl.BlockSpec((tm, CSp), lambda i, k: (i, 0)),
            scratch_shapes=[pltpu.VMEM((tm, CSp), jnp.float32)],   # f32 accumulator
        ),
        compiler_params=pltpu.CompilerParams(
            dimension_semantics=("parallel", "arbitrary"),
            vmem_limit_bytes=40 * 1024 * 1024,
        ),
        cost_estimate=pl.CostEstimate(
            flops=2 * Np * Dp * CSp,
            transcendentals=Np,
            bytes_accessed=(Np * Dp + Dp * CSp) * itemsize + Np * CSp * 4,
        ),
    )(x, w_p, b_p)
    return out[:N, :CS]


def _reference_f32(feat_nchw, params, eps=1e-5):
    """Pure-JAX f32 replica of the PyTorch module's forward (bn1 -> fc1 -> bn2 -> normalize)."""
    N = feat_nchw.shape[0]
    s1 = params["bn1_gamma"] / jnp.sqrt(params["bn1_var"] + eps)
    b1 = params["bn1_beta"] - params["bn1_mean"] * s1
    h = feat_nchw * s1[None, :, None, None] + b1[None, :, None, None]
    h = h.reshape(N, -1)
    z = h @ params["fc1_w"].T + params["fc1_b"]
    s2 = params["bn2_gamma"] / jnp.sqrt(params["bn2_var"] + eps)
    b2 = params["bn2_beta"] - params["bn2_mean"] * s2
    z = z * s2 + b2
    n = jnp.sqrt(jnp.sum(z * z, axis=1, keepdims=True))
    return z / jnp.maximum(n, 1e-12)


def _reference_folded(feat_nchw, prepared):
    """Pure-JAX replica of the folded/bf16 math (tight structural check of the kernel)."""
    N = feat_nchw.shape[0]
    D, CS = prepared["D"], prepared["CS"]
    x = feat_nchw.reshape(N, -1).astype(prepared["w"].dtype)
    z = jnp.dot(x, prepared["w"][:D, :CS], preferred_element_type=jnp.float32)
    z = z + prepared["b"][0, :CS]
    n = jnp.sqrt(jnp.sum(z * z, axis=1, keepdims=True))
    return z / jnp.maximum(n, 1e-12)


if __name__ == "__main__":
    # Small shapes consistent with the module: fc1 = Linear(in_features*5*8, channel_size).
    N, C, H, W = 4, 32, 5, 8          # in_features=32 stand-in, backbone spatial 5x8
    CS = 128                          # channel_size stand-in (lane-dense; real model uses 512)
    D = C * H * W                     # 1280

    key = jax.random.PRNGKey(0)
    ks = jax.random.split(key, 10)
    feat = jax.random.normal(ks[0], (N, C, H, W), dtype=jnp.float32)

    params = {
        # BatchNorm2d(in_features) eval-mode params
        "bn1_gamma": 1.0 + 0.1 * jax.random.normal(ks[1], (C,), dtype=jnp.float32),
        "bn1_beta": 0.1 * jax.random.normal(ks[2], (C,), dtype=jnp.float32),
        "bn1_mean": 0.05 * jax.random.normal(ks[3], (C,), dtype=jnp.float32),
        "bn1_var": jnp.abs(1.0 + 0.1 * jax.random.normal(ks[4], (C,), dtype=jnp.float32)),
        # Linear(D, CS)
        "fc1_w": jax.random.normal(ks[5], (CS, D), dtype=jnp.float32) / jnp.sqrt(D),
        "fc1_b": 0.01 * jax.random.normal(ks[6], (CS,), dtype=jnp.float32),
        # BatchNorm1d(CS)
        "bn2_gamma": 1.0 + 0.1 * jax.random.normal(ks[7], (CS,), dtype=jnp.float32),
        "bn2_beta": 0.1 * jax.random.normal(ks[8], (CS,), dtype=jnp.float32),
        "bn2_mean": 0.05 * jax.random.normal(ks[9], (CS,), dtype=jnp.float32),
        "bn2_var": jnp.ones((CS,), dtype=jnp.float32),
    }

    # One-time offline fold (would be cached for the real model).
    prepared = prepare_arc_head_params(params, (C, H, W))

    # Run with a small tk to exercise the multi-step K reduction (5 K-tiles), and once with the
    # production tile size (single K-tile at these toy shapes).
    out_multi = jax.block_until_ready(arc_head_forward(feat, prepared, tk_max=256))
    out_single = jax.block_until_ready(arc_head_forward(feat, prepared, tk_max=4096))

    ref_folded = _reference_folded(feat, prepared)   # same bf16 folded math -> tight check
    ref_f32 = _reference_f32(feat, params)           # original module math   -> bf16-loose check

    assert out_multi.shape == (N, CS)
    assert jnp.allclose(out_multi, ref_folded, atol=1e-3, rtol=1e-3), "kernel vs folded ref"
    assert jnp.allclose(out_single, ref_folded, atol=1e-3, rtol=1e-3), "kernel(tk=full) vs folded ref"
    # bf16 weight/activation streaming vs full-f32 torch-equivalent reference (loose tolerance).
    assert jnp.allclose(out_multi, ref_f32, atol=2e-2, rtol=2e-2), "kernel vs f32 reference"

    print("KERNEL_OK")
</pallas_src>

<mosaic_0001>
module attributes {stable_mosaic.version = 11 : i64} {
  func.func @_arc_head_kernel(%arg0: i32, %arg1: i32, %arg2: memref<8x256xbf16, #tpu.memory_space<vmem>>, %arg3: memref<256x128xbf16, #tpu.memory_space<vmem>>, %arg4: memref<1x128xf32, #tpu.memory_space<vmem>>, %arg5: memref<8x128xf32, #tpu.memory_space<vmem>>, %arg6: memref<8x128xf32, #tpu.memory_space<vmem>>) attributes {dimension_semantics = [#tpu.dimension_semantics<parallel>, #tpu.dimension_semantics<arbitrary>], iteration_bounds = array<i64: 1, 5>, scalar_prefetch = 0 : i64, scratch_operands = 1 : i64, tpu.core_type = #tpu.core_type<tc>, window_params = [{transform_indices = @transform_0, window_bounds = array<i64: 8, 256>}, {transform_indices = @transform_1, window_bounds = array<i64: 256, 128>}, {pipeline_mode = #tpu.pipeline_mode<synchronous>, transform_indices = @transform_2, window_bounds = array<i64: 1, 128>}, {transform_indices = @transform_3, window_bounds = array<i64: 8, 128>}]} {
    %c0_i32 = arith.constant 0 : i32
    %0 = arith.cmpi eq, %arg1, %c0_i32 : i32
    %1 = arith.extui %0 : i1 to i32
    %c0_i32_0 = arith.constant 0 : i32
    %2 = arith.cmpi ne, %1, %c0_i32_0 : i32
    scf.if %2 {
      %cst_9 = arith.constant 0.000000e+00 : f32
      %12 = vector.broadcast %cst_9 : f32 to vector<8x128xf32>
      %c0_10 = arith.constant 0 : index
      %c0_11 = arith.constant 0 : index
      %13 = vector.load %arg6[%c0_10, %c0_11] : memref<8x128xf32, #tpu.memory_space<vmem>>, vector<8x128xf32>
      tpu.vector_store %arg6[%c0_10, %c0_11], %12 {strides = array<i32>} : memref<8x128xf32, #tpu.memory_space<vmem>>, vector<8x128xf32>,
    } else {
    }
    %c0 = arith.constant 0 : index
    %c0_1 = arith.constant 0 : index
    %3 = vector.load %arg6[%c0, %c0_1] : memref<8x128xf32, #tpu.memory_space<vmem>>, vector<8x128xf32>
    %c0_2 = arith.constant 0 : index
    %c0_3 = arith.constant 0 : index
    %4 = vector.load %arg2[%c0_2, %c0_3] : memref<8x256xbf16, #tpu.memory_space<vmem>>, vector<8x256xbf16>
    %c0_4 = arith.constant 0 : index
    %c0_5 = arith.constant 0 : index
    %5 = vector.load %arg3[%c0_4, %c0_5] : memref<256x128xbf16, #tpu.memory_space<vmem>>, vector<256x128xbf16>
    %cst = arith.constant dense<0.000000e+00> : vector<8x128xf32>
    %6 = tpu.matmul %4, %5, %cst {dimension_numbers = #tpu.dot_dimension_numbers<[1], [0], [0], [1], [0, 0, 1, 1], [], []>} : vector<8x256xbf16>, vector<256x128xbf16>, vector<8x128xf32> -> vector<8x128xf32>
    %7 = arith.addf %3, %6 : vector<8x128xf32>
    %c0_6 = arith.constant 0 : index
    %c0_7 = arith.constant 0 : index
    %8 = vector.load %arg6[%c0_6, %c0_7] : memref<8x128xf32, #tpu.memory_space<vmem>>, vector<8x128xf32>
    tpu.vector_store %arg6[%c0_6, %c0_7], %7 {strides = array<i32>} : memref<8x128xf32, #tpu.memory_space<vmem>>, vector<8x128xf32>,
    %c4_i32 = arith.constant 4 : i32
    %9 = arith.cmpi eq, %arg1, %c4_i32 : i32
    %10 = arith.extui %9 : i1 to i32
    %c0_i32_8 = arith.constant 0 : i32
    %11 = arith.cmpi ne, %10, %c0_i32_8 : i32
    scf.if %11 {
      %c0_9 = arith.constant 0 : index
      %c0_10 = arith.constant 0 : index
      %12 = vector.load %arg6[%c0_9, %c0_10] : memref<8x128xf32, #tpu.memory_space<vmem>>, vector<8x128xf32>
      %c0_11 = arith.constant 0 : index
      %c0_12 = arith.constant 0 : index
      %13 = vector.load %arg4[%c0_11, %c0_12] : memref<1x128xf32, #tpu.memory_space<vmem>>, vector<1x128xf32>
      %14 = vector.broadcast %13 : vector<1x128xf32> to vector<8x128xf32>
      %15 = arith.addf %12, %14 : vector<8x128xf32>
      %16 = arith.mulf %15, %15 : vector<8x128xf32>
      %cst_13 = arith.constant dense<0.000000e+00> : vector<8xf32>
      %17 = vector.multi_reduction <add>, %16, %cst_13 [1] : vector<8x128xf32> to vector<8xf32>
      %18 = vector.shape_cast %17 : vector<8xf32> to vector<8x1xf32>
      %cst_14 = arith.constant 1.000000e-24 : f32
      %19 = vector.broadcast %cst_14 : f32 to vector<8x1xf32>
      %20 = arith.maximumf %18, %19 : vector<8x1xf32>
      %21 = math.rsqrt %20 : vector<8x1xf32>
      %22 = vector.broadcast %21 : vector<8x1xf32> to vector<8x128xf32>
      %23 = arith.mulf %15, %22 : vector<8x128xf32>
      %c0_15 = arith.constant 0 : index
      %c0_16 = arith.constant 0 : index
      %24 = vector.load %arg5[%c0_15, %c0_16] : memref<8x128xf32, #tpu.memory_space<vmem>>, vector<8x128xf32>
      tpu.vector_store %arg5[%c0_15, %c0_16], %23 {strides = array<i32>} : memref<8x128xf32, #tpu.memory_space<vmem>>, vector<8x128xf32>,
    } else {
    }
    return
  }
  func.func @transform_0(%arg0: i32, %arg1: i32) -> (i32, i32) {
    %c0_i32 = arith.constant 0 : i32
    return %arg0, %arg1 : i32, i32
  }
  func.func @transform_1(%arg0: i32, %arg1: i32) -> (i32, i32) {
    %c0_i32 = arith.constant 0 : i32
    %c0_i32_0 = arith.constant 0 : i32
    return %arg1, %c0_i32 : i32, i32
  }
  func.func @transform_2(%arg0: i32, %arg1: i32) -> (i32, i32) {
    %c0_i32 = arith.constant 0 : i32
    %c0_i32_0 = arith.constant 0 : i32
    %c0_i32_1 = arith.constant 0 : i32
    return %c0_i32, %c0_i32_0 : i32, i32
  }
  func.func @transform_3(%arg0: i32, %arg1: i32) -> (i32, i32) {
    %c0_i32 = arith.constant 0 : i32
    %c0_i32_0 = arith.constant 0 : i32
    return %arg0, %c0_i32 : i32, i32
  }
}

</mosaic_0001>

<bundles_post_ra>
// kernel: tpu_custom_call.1
= control target key start
LH: loop header
LB: loop body
LE: loop exit
PB: predicated region body
PF: predicated region fallthrough
CT: control target
= control target key end

     0   :  { %8 = vsyncpa [#allocation4], 0  ;;  %s1087_s0 = inlined_call_operand.hbm [shape: bf16[8,1280], index: 0, kind: input, shape index: {}]   ;;  %s1088_s1 = inlined_call_operand.hbm [shape: bf16[1280,128], index: 1, kind: input, shape index: {}]   ;;  %s1089_s2 = inlined_call_operand.vmem [shape: f32[1,128], index: 2, kind: input, shape index: {}]   ;;  %s1090_s3 = inlined_call_operand.hbm [shape: f32[8,128], index: 3, kind: output, shape index: {}]  }
   0x1   :  { %10 = vsyncpa [#allocation4 + $0x1], 0 }
   0x2   :  { %11 = vsyncpa [#allocation7], 0 }
   0x3   :  { %13 = vsyncpa [#allocation7 + $0x1], 0 }
   0x4   :  { %14 = vsyncpa [#allocation5], 0  ;;  %s862_s12 = smov 0   ;;  %s864_s13 = smov 0  }
   0x5   :  { %s866_s14 = smov 0   ;;  %s868_s15 = smov 0  }
   0x6   :  { %s870_s16 = smov 0   ;;  %s872_s17 = smov 0  }
   0x7 LB: > { %s539_s18 = sadd.s32 4294967295, %s834_s17   ;;  %s29_s19 = sadd.s32 1, %s830_s16  ;;  %s834_s17 = sphi %s872_s17, %s20_s17   ;;  %s830_s16 = sphi %s870_s16, %s1104_s16   ;;  %s826_s15 = sphi %s868_s15, %s1103_s15   ;;  %s822_s14 = sphi %s866_s14, %s1102_s14   ;;  %s818_s13 = sphi %s864_s13, %s1101_s13   ;;  %s814_s12 = sphi %s862_s12, %s1100_s12  }
   0x8   : > { %p30_p0 = scmp.ge.s32.totalorder %s29_s19, 5  ;;  %s41_s20 = sadd.s32 1, %s822_s14 }
   0x9   : > { %p48_p1 = scmp.ne.s32.totalorder %s822_s14, %s818_s13  ;;  %p49_p2 = scmp.eq.s32.totalorder %s834_s17, 0 }
   0xa   : > { %s1106_s19 = smov (%p30_p0, %s29_s19), 0  ;;  %p54_p4 = scmp.ne.s32.totalorder %s818_s13, %s814_s12 }
   0xb   : > { %p898_p3 = por %p49_p2, %p48_p1  ;;  %s37_s22 = ssub.s32 %s830_s16, %s1106_s19 }
   0xc   : > { %p55_p5 = scmp.eq.s32.totalorder %s539_s18, 0  ;;  %p39_p6 = scmp.eq.s32.totalorder %s37_s22, 0 }
   0xd   : > { %p615_p8 = scmp.lt.s32.totalorder %s834_s17, 5  ;;  %s916_s25 = sand.u32 1, %s822_s14  }
   0xe   : > { %p907_p7 = por %p55_p5, %p54_p4  ;;  %s576_s26 = sshll.u32 %s830_s16, 7 }
   0xf   : > { %s913_s24 = scalar_select %p39_p6, %s822_s14, %s41_s20  }
  0x10   : > { %s1093_s23 = scalar_select %p907_p7, 1, 0 }
  0x11   : > { %s542_s27 = sshll.u32 %s916_s25, 3  ;;  %s923_s30 = scalar_lea.hbm %s1087_s0, %s576_s26 }
  0x12   : > { %s158_s4 = scalar_lea.vmem [#allocation3], %s542_s27  ;;  %p927_p9 = pnand %p615_p8, %p898_p3 }
  0x13   : > { %s168_s5 = sshll.u32 %s158_s4, 4  ;;  %s155_s7 = scalar_lea.sflag [#allocation4], %s916_s25  ;;  %s931_s5 = int_to_ptr.vmem [resolvable:$true] %s168_s5 }
  0x14   : > { %s690_s8 = scalar_lea.hbm %s923_s30, 128  ;;  %p692_p13 = pneg %p927_p9 }
  0x15   : > { %p691_p12 = scmp.ne.s32.totalorder %s923_s30, %s690_s8  ;;  %s695_s11 = scalar_lea.hbm %s1087_s0, 640 }
  0x16   : > { %p696_p2 = scmp.lt.u32.totalorder %s923_s30, %s1087_s0  ;;  %p697_p3 = scmp.lt.u32.totalorder %s695_s11, %s690_s8 }
  0x17   : > { %p693_p0 = pnand %p692_p13, %p691_p12  ;;  %p699_p5 = scmp.lt.u32.totalorder %s690_s8, %s923_s30 }
  0x18   : > { %p698_p4 = por %p697_p3, %p696_p2 }
  0x19   : > { %p694_p1 = pneg %p693_p0 }
  0x1a   : > { %p700_p6 = por %p699_p5, %p698_p4 }
  0x1c   : > { %p701_p8 = pnand %p700_p6, %p694_p1 }
  0x1e   : > { %704 = shalt.err (!%p701_p8)
}
  0x1f   : > { %s705_s21 = scalar_lea.vmem %s931_s5, 128  ;;  %s836_s22 = smov [#allocation3]  }
  0x20   : > { %p706_p12 = scmp.ne.s32.totalorder %s931_s5, %s705_s21  ;;  %s710_s26 = sshll.u32 %s836_s22, 4  ;;  %s711_s26 = int_to_ptr.vmem [resolvable:$false] %s710_s26 }
  0x21   : > { %s712_s27 = scalar_lea.vmem %s711_s26, 256  ;;  %p713_p11 = scmp.lt.s32.totalorder %s931_s5, %s711_s26 }
  0x22   : > { %p708_p0 = pnand %p706_p12, %p692_p13  ;;  %p714_p2 = scmp.lt.s32.totalorder %s712_s27, %s705_s21 }
  0x24   : > { %p709_p10 = pneg %p708_p0  ;;  %p715_p3 = por %p714_p2, %p713_p11 }
  0x26   : > { %p716_p4 = pnand %p715_p3, %p709_p10 }
  0x28   : > { %719 = shalt.err (!%p716_p4)
}
  0x29   : > { %611 = dma.hbm_to_vmem [thread:$0]  (!%p927_p9), %s923_s30, 128, %s931_s5, %s155_s7  }
  0x2a   : > { %p1095_p1 = scmp.lt.s32.totalorder %s834_s17, 6  ;;  %p1096_p5 = scmp.ge.s32.totalorder %s834_s17, 1 }
  0x2b   : > { %s545_s29 = sshll.u32 %s916_s25, 7  ;;  %s577_s4 = sshll.u32 %s830_s16, 11 }
  0x2c   : > { %p965_p6 = pnand %p1096_p5, %p1095_p1  ;;  %s974_s10 = scalar_lea.hbm %s1088_s1, %s577_s4 }
  0x2d   : > { %s179_s11 = scalar_lea.vmem [#allocation6], %s545_s29  ;;  %s176_s30 = scalar_lea.sflag [#allocation7], %s916_s25 }
  0x2e   : > { %s186_s12 = sshll.u32 %s179_s11, 4  ;;  %s720_s5 = scalar_lea.hbm %s974_s10, 2048  ;;  %s976_s12 = int_to_ptr.vmem [resolvable:$true] %s186_s12 }
  0x2f   : > { %p721_p10 = scmp.ne.s32.totalorder %s974_s10, %s720_s5  ;;  %s725_s21 = scalar_lea.hbm %s1088_s1, 10240 }
  0x30   : > { %p726_p12 = scmp.lt.u32.totalorder %s974_s10, %s1088_s1  ;;  %p727_p0 = scmp.lt.u32.totalorder %s725_s21, %s720_s5 }
  0x31   : > { %p723_p11 = pnand %p721_p10, %p692_p13  ;;  %p729_p3 = scmp.lt.u32.totalorder %s720_s5, %s974_s10 }
  0x32   : > { %p728_p2 = por %p727_p0, %p726_p12 }
  0x33   : > { %p724_p8 = pneg %p723_p11 }
  0x34   : > { %p730_p4 = por %p729_p3, %p728_p2 }
  0x36   : > { %p731_p1 = pnand %p730_p4, %p724_p8 }
  0x38   : > { %734 = shalt.err (!%p731_p1)
}
  0x39   : > { %s735_s27 = scalar_lea.vmem %s976_s12, 2048  ;;  %s837_s29 = smov [#allocation6]  }
  0x3a   : > { %p736_p5 = scmp.ne.s32.totalorder %s976_s12, %s735_s27  ;;  %s740_s4 = sshll.u32 %s837_s29, 4  ;;  %s741_s4 = int_to_ptr.vmem [resolvable:$false] %s740_s4 }
  0x3b   : > { %s742_s8 = scalar_lea.vmem %s741_s4, 4096  ;;  %p743_p7 = scmp.lt.s32.totalorder %s976_s12, %s741_s4 }
  0x3c   : > { %p738_p10 = pnand %p736_p5, %p692_p13  ;;  %p744_p12 = scmp.lt.s32.totalorder %s742_s8, %s735_s27 }
  0x3e   : > { %p739_p11 = pneg %p738_p10  ;;  %p745_p0 = por %p744_p12, %p743_p7 }
  0x40   : > { %p746_p2 = pnand %p745_p0, %p739_p11 }
  0x42   : > { %749 = shalt.err (!%p746_p2)
}
  0x43   : > { %s838_s9 = smov 64   ;;  %s839_s11 = smov 4  }
  0x44   : > { %614 = dma.hbm_to_vmem [thread:$0]  (!%p927_p9), %s974_s10, 2048, %s976_s12, %s176_s30, %s838_s9, %s838_s9, %s839_s11  }
  0x45   : > { %198 = sbr.rel (%p965_p6) target bundleno = 534 (0x216), region = 32  ;;  %s200_s5 = sand.u32 (!%p965_p6), 1, %s818_s13  }
  0x46   : > { %s549_s7 = sshll.u32 (!%p965_p6), %s200_s5, 3  ;;  %s201_s20 = scalar_lea.sflag (!%p965_p6), [#allocation4], %s200_s5 }
  0x47   : > { %s1007_s21 = scalar_lea.vmem (!%p965_p6), [#allocation3], %s549_s7  ;;  %p1098_p7 = scmp.ne.s32.totalorder (!%p965_p6), %s1093_s23, 0 }
  0x4c   : > { %801 = dma.done.wait (%p1098_p7), %s201_s20, 128  }
  0x4d   : > { %803 = vsyncadd (%p1098_p7), %s201_s20, 4294967168  ;;  %s550_s22 = sshll.u32 %s200_s5, 7  ;;  %s210_s6 = scalar_lea.sflag [#allocation7], %s200_s5 }
  0x4e   : > { %s1013_s25 = scalar_lea.vmem [#allocation6], %s550_s22 }
  0x4f   : > { %805 = dma.done.wait (%p1098_p7), %s210_s6, 2048  }
  0x50   : > { %807 = vsyncadd (%p1098_p7), %s210_s6, 4294965248  ;;  %p551_p9 = scmp.ne.s32.totalorder %s826_s15, 0 }
  0x51   : > { %v840_v0 = vmov (!%p551_p9), 0.0  }
  0x52   : > { %242 = sbr.rel (%p551_p9) target bundleno = 89 (0x59), region = 44  ;;  %243 = vst [vmem:[#allocation2] sm:$0xff] (!%p551_p9), %v840_v0 }
  0x59 PF: > { %v670_v1 = vld [vmem:[%s1013_s25 + $0x40] sm:$0xff]   ;;  %v672_v3 = vld [vmem:[%s1013_s25 + $0x48] sm:$0xff]   ;;  %v674_v5 = vld [vmem:[%s1013_s25 + $0x50] sm:$0xff]   ;;  %p570_p13 = scmp.ne.s32.totalorder %s826_s15, 4 }
  0x5a   : > { %v671_v2 = vld [vmem:[%s1013_s25] sm:$0xff]   ;;  %578 = vmatprep.subr.bf16.mxu0 %v670_v1  ;;  %v673_v4 = vld [vmem:[%s1013_s25 + $0x8] sm:$0xff]   ;;  %v675_v6 = vld [vmem:[%s1013_s25 + $0x10] sm:$0xff]  }
  0x5b   : > { %579 = vmatpush3.bf16.msra.mxu0 %v671_v2  ;;  %v676_v7 = vld [vmem:[%s1013_s25 + $0x58] sm:$0xff]   ;;  %v678_v9 = vld [vmem:[%s1013_s25 + $0x60] sm:$0xff]   ;;  %v680_v11 = vld [vmem:[%s1013_s25 + $0x68] sm:$0xff]  }
  0x5c   : > { %580 = vmatprep.subr.bf16.mxu0 %v672_v3  ;;  %v677_v8 = vld [vmem:[%s1013_s25 + $0x18] sm:$0xff]   ;;  %v679_v10 = vld [vmem:[%s1013_s25 + $0x20] sm:$0xff]   ;;  %v681_v14 = vld [vmem:[%s1013_s25 + $0x28] sm:$0xff]  }
  0x5d   : > { %v245_v12 = vld [vmem:[%s1007_s21] sm:$0xff]  ;;  %v244_v21 = vld [vmem:[#allocation2] sm:$0xff] }
  0x5e   : > { %v553_v13 = vcombine.high %v245_v12, %v245_v12  ;;  %v682_v15 = vld [vmem:[%s1013_s25 + $0x70] sm:$0xff]   ;;  %v684_v17 = vld [vmem:[%s1013_s25 + $0x78] sm:$0xff]   ;;  %v552_v19 = vcombine.low %v245_v12, %v245_v12  ;;  %v571_v28 = vld [vmem:[%s1089_s2] ss:$0 sm:$0xff] (!%p570_p13) }
  0x5f   : > { %581 = vmatpush3.bf16.msra.mxu0 %v673_v4  ;;  %v683_v16 = vld [vmem:[%s1013_s25 + $0x30] sm:$0xff]   ;;  %v685_v18 = vld [vmem:[%s1013_s25 + $0x38] sm:$0xff]  }
  0x60   : > { %582 = vmatprep.subr.bf16.mxu0 %v674_v5  ;;  %413 = vmatprep.mubr.bf16.mxu0 %v553_v13 }
  0x63   : > { %583 = vmatpush3.bf16.msra.mxu0 %v675_v6 }
  0x64   : > { %584 = vmatprep.subr.bf16.mxu0 %v676_v7 }
  0x67   : > { %585 = vmatpush3.bf16.msra.mxu0 %v677_v8 }
  0x68   : > { %586 = vmatprep.subr.bf16.mxu0 %v678_v9 }
  0x6b   : > { %587 = vmatpush3.bf16.msra.mxu0 %v679_v10 }
  0x6c   : > { %588 = vmatprep.subr.bf16.mxu0 %v680_v11 }
  0x6f   : > { %589 = vmatpush3.bf16.msra.mxu0 %v681_v14 }
  0x70   : > { %590 = vmatprep.subr.bf16.mxu0 %v682_v15 }
  0x73   : > { %591 = vmatpush3.bf16.msra.mxu0 %v683_v16 }
  0x74   : > { %592 = vmatprep.subr.bf16.mxu0 %v684_v17 }
  0x77   : > { %593 = vmatpush3.bf16.msra.mxu0 %v685_v18 }
  0x7a   : > { %414 = vmatmul.mubr.bf16.vlgmr.msra.gmra.mrb[0].mxu0 %v552_v19 }
 0x14d   : > { %v594_v20 = vpop.f32.mrb[0].mxu0  ;;  %426 = sbr.rel (%p570_p13) target bundleno = 509 (0x1fd), region = 48 }
 0x14e   : > { %v595_v22 = vpop.f32.mrb[1].mxu0 }
 0x14f   : > { %v596_v23 = vadd.f32 %v595_v22, %v594_v20  ;;  %v597_v24 = vpop.f32.mrb[2].mxu0 }
 0x150   : > { %v598_v25 = vpop.f32.mrb[3].mxu0 }
 0x151   : > { %v421_v26 = vadd.f32 %v596_v23, %v244_v21 }
 0x153   : > { %422 = vst [vmem:[#allocation2] sm:$0xff] %v421_v26 }
 0x15a   : > { %v427_v27 = vld [vmem:[#allocation2] sm:$0xff] }
 0x15b   : > { %v435_v29 = vadd.f32 %v571_v28, %v427_v27 }
 0x15d   : > { %v436_v30 = vmul.f32 %v435_v29, %v435_v29 }
 0x15f   : > { %437 = vadd.xlane.f32.xlu0 %v436_v30 }
 0x1ec   : > { %v438_v31 = vpop.xlane.xlu0 %437 }
 0x1ed   : > { %v439_v32 = vmax.f32 %v438_v31, 1e-24 }
 0x1ef   : > { %688 = vrsqrt.f32 %v439_v32 }
 0x1f9   : > { %v689_v33 = vpop.eup %688 }
 0x1fa   : > { %v441_v34 = vmul.f32 %v689_v33, %v435_v29 }
 0x1fc   : > { %442 = vst [vmem:[#allocation8] sm:$0xff] %v441_v34 }
 0x1fd PF: > { %p1043_p6 = scmp.eq.s32.totalorder %s539_s18, 4  ;;  %s841_s10 = smov [#allocation8]  }
 0x1fe   : > { %s452_s12 = sshll.u32 %s841_s10, 4  ;;  %s453_s12 = int_to_ptr.vmem [resolvable:$true] %s452_s12 }
 0x1ff   : > { %s750_s30 = scalar_lea.vmem %s453_s12, 128  ;;  %p757_p1 = scmp.lt.s32.totalorder %s453_s12, %s453_s12 }
 0x200   : > { %p751_p8 = scmp.ne.s32.totalorder %s453_s12, %s750_s30  ;;  %p758_p5 = scmp.lt.s32.totalorder %s750_s30, %s750_s30 }
 0x202   : > { %p752_p3 = pnand %p751_p8, %p1043_p6  ;;  %p759_p10 = por %p758_p5, %p757_p1 }
 0x204   : > { %p753_p4 = pneg %p752_p3 }
 0x206   : > { %p760_p11 = pnand %p759_p10, %p753_p4 }
 0x208   : > { %763 = shalt.err (!%p760_p11)
}
 0x209   : > { %s764_s18 = scalar_lea.hbm %s1090_s3, 128 }
 0x20a   : > { %p765_p12 = scmp.ne.s32.totalorder %s1090_s3, %s764_s18  ;;  %p770_p7 = scmp.lt.u32.totalorder %s764_s18, %s1090_s3 }
 0x20c   : > { %p766_p0 = pnand %p765_p12, %p1043_p6 }
 0x20e   : > { %p767_p2 = pneg %p766_p0 }
 0x210   : > { %p772_p9 = pnand %p770_p7, %p767_p2 }
 0x212   : > { %775 = shalt.err (!%p772_p9)
}
 0x213   : > { %605 = dma.vmem_to_hbm [thread:$0]  (%p1043_p6), %s453_s12, 128, %s1090_s3, [#allocation5]  }
 0x214   : > { %809 = dma.done.wait (%p1043_p6), [#allocation5], 128  }
 0x215   : > { %811 = vsyncadd (%p1043_p6), [#allocation5], 4294967168 }
 0x216 PF: > { %s20_s17 = sadd.s32 1, %s834_s17   ;;  %s1100_s12 = smov %s818_s13 }
 0x217   : > { %p17_p13 = scmp.ge.s32.totalorder %s20_s17, 7   ;;  %s1101_s13 = smov %s822_s14 }
 0x218   : > { %s1102_s14 = smov %s913_s24  ;;  %s1103_s15 = smov %s830_s16 }
 0x219   : > { %s1104_s16 = smov %s1106_s19  ;;  %19 = sbr.rel (!%p17_p13) target bundleno = 7 (0x7), region = 91 }
 0x220   :  { %465 = vsyncpa [#allocation4], 1 }
 0x221   :  { %467 = vsyncpa [#allocation4 + $0x1], 1 }
 0x222   :  { %468 = vsyncpa [#allocation7], 1 }
 0x223   :  { %470 = vsyncpa [#allocation7 + $0x1], 1 }
 0x224   :  { %471 = vsyncpa [#allocation5], 1 }
 0x225   :  { %473 = vsyncpa [#allocation5 + $0x1], 1 }

</bundles_post_ra>
